<compile_context>
chip_gen: v7x
topology: tpu7x:2x2x1
jax: 0.10.0
libtpu: 0.0.40
codegen_flags: <defaults>
</compile_context>

<pallas_src>
import math
import functools

import jax
import jax.numpy as jnp
from jax import lax
from jax.experimental import pallas as pl
from jax.experimental.pallas import tpu as pltpu  # noqa: F401  (kept for TPU-specific tuning hooks)

D_MODEL = 32
N_HEADS = 4
SEQ = 8
BATCH = 2
LN_EPS = 1e-5

# rows of the (8, 128) bias / layer-norm slab (each row starts at lane 0)
R_BQKV, R_B1, R_BO, R_B2, R_G1, R_BE1, R_G2, R_BE2 = range(8)


def gpt_block_kernel(x_ref, w_ref, vec_ref, o_ref, *, seq, n_heads):
    # x_ref: (M, D) with M = B*S rows; w_ref: (D, 16D) lane-aligned; vec_ref: (8, 4D)
    M, D = x_ref.shape
    hd = D // n_heads
    # 128-lane-aligned regions of the weight slab
    OW_1, OW_2, OW_QKV, OW_O = 0, 4 * D, 8 * D, 12 * D

    x = x_ref[...].astype(jnp.float32)                          # (M, D)

    # ---- fused QKV projection: one (M,D)@(D,4D) MXU push (output padded to 128 lanes) ----
    qkv = jnp.dot(x, w_ref[:, OW_QKV:OW_QKV + 4 * D],
                  preferred_element_type=jnp.float32) + vec_ref[R_BQKV:R_BQKV + 1, :]

    # ---- additive block-diagonal causal mask bias, built once ----
    row = lax.broadcasted_iota(jnp.int32, (M, M), 0)
    col = lax.broadcasted_iota(jnp.int32, (M, M), 1)
    if seq & (seq - 1) == 0:                                    # power-of-two seq -> shift
        shift = seq.bit_length() - 1
        row_seg = lax.shift_right_logical(row, shift)
        col_seg = lax.shift_right_logical(col, shift)
    else:
        row_seg = row // seq
        col_seg = col // seq
    invalid = (col > row) | (row_seg != col_seg)
    mask_bias = jnp.where(invalid, jnp.float32(-1e30), jnp.float32(0.0))   # (M, M)

    # ---- head split: lane slices stacked on a leading batch axis (no in-register reshape) ----
    def split_heads(off):
        return jnp.stack([qkv[:, off + h * hd: off + (h + 1) * hd]
                          for h in range(n_heads)], axis=0)      # (H, M, hd)

    q = split_heads(0)          # 1/sqrt(hd) already folded into packed Wq / bq
    k = split_heads(D)
    v = split_heads(2 * D)

    # ---- batched multi-head attention: one MXU stage per matmul instead of per head ----
    s = jnp.einsum("hmd,hnd->hmn", q, k, preferred_element_type=jnp.float32)   # (H, M, M)
    s = s + mask_bias[None, :, :]
    m = jnp.max(s, axis=-1, keepdims=True)
    p = jnp.exp(s - m)
    denom = jnp.sum(p, axis=-1, keepdims=True)
    pw = p * pl.reciprocal(denom, approx=True)                   # softmax (EUP recip)
    # TODO(synk): attention-weight dropout (p=0.2) omitted (eval-mode identity).
    av = jnp.einsum("hmn,hnd->hmd", pw, v, preferred_element_type=jnp.float32)  # (H, M, hd)

    # ---- re-pack heads into lanes, ONE fused output projection (M,D)@(D,D) ----
    att = jnp.concatenate([av[h] for h in range(n_heads)], axis=-1)             # (M, D)
    att = jnp.dot(att, w_ref[:, OW_O:OW_O + D],
                  preferred_element_type=jnp.float32) + vec_ref[R_BO:R_BO + 1, :D]

    # ---- residual + LayerNorm 1 ----
    h1 = x + att
    mu1 = jnp.mean(h1, axis=-1, keepdims=True)
    var1 = jnp.mean((h1 - mu1) ** 2, axis=-1, keepdims=True)
    adn = (h1 - mu1) * lax.rsqrt(var1 + LN_EPS) * vec_ref[R_G1:R_G1 + 1, :D] \
          + vec_ref[R_BE1:R_BE1 + 1, :D]

    # ---- feed-forward: Linear -> GELU(exact erf) -> Linear (W2 stored transposed) ----
    f = jnp.dot(adn, w_ref[:, OW_1:OW_1 + 4 * D],
                preferred_element_type=jnp.float32) + vec_ref[R_B1:R_B1 + 1, :]
    f = 0.5 * f * (1.0 + lax.erf(f * (1.0 / math.sqrt(2.0))))
    f = lax.dot_general(f, w_ref[:, OW_2:OW_2 + 4 * D],
                        dimension_numbers=(((1,), (1,)), ((), ())),
                        preferred_element_type=jnp.float32) + vec_ref[R_B2:R_B2 + 1, :D]

    # ---- residual + LayerNorm 2 ----
    h2 = f + adn
    mu2 = jnp.mean(h2, axis=-1, keepdims=True)
    var2 = jnp.mean((h2 - mu2) ** 2, axis=-1, keepdims=True)
    out = (h2 - mu2) * lax.rsqrt(var2 + LN_EPS) * vec_ref[R_G2:R_G2 + 1, :D] \
          + vec_ref[R_BE2:R_BE2 + 1, :D]

    o_ref[...] = out.astype(o_ref.dtype)


def pack_params(params):
    """Pack the 16 parameter tensors into 2 lane-aligned VMEM slabs."""
    D = params["wq"].shape[0]
    assert (4 * D) % 128 == 0, "packing assumes 4*D is a multiple of the 128-lane width"
    hd = D // N_HEADS
    scale = jnp.float32(1.0 / math.sqrt(hd))
    f32 = jnp.float32
    # fold 1/sqrt(head_dim) into the query projection (one-time, parameter-side)
    wq = params["wq"] * scale
    bq = params["bq"] * scale

    # weight slab (D, 16D): every region starts on a 128-lane boundary
    w_blob = jnp.concatenate(
        [params["w1"],                                      # [ 0D, 4D)  W1
         params["w2"].T,                                    # [ 4D, 8D)  W2^T
         wq, params["wk"], params["wv"],
         jnp.zeros((D, D), f32),                            # [ 8D,12D)  QKV padded 3D->4D
         params["wo"], jnp.zeros((D, 3 * D), f32)],         # [12D,16D)  Wo  padded  D->4D
        axis=1)

    # bias / LayerNorm slab (8, 4D): one 128-lane row per vector, all lane-0 aligned
    def row(v):
        return jnp.pad(v, ((0, 0), (0, 4 * D - v.shape[1])))

    vec_blob = jnp.concatenate(
        [row(jnp.concatenate([bq, params["bk"], params["bv"]], axis=1)),  # R_BQKV
         params["b1"],                                                    # R_B1 (already 4D wide)
         row(params["bo"]), row(params["b2"]),                            # R_BO, R_B2
         row(params["g1"]), row(params["be1"]),                           # R_G1, R_BE1
         row(params["g2"]), row(params["be2"])], axis=0)                  # R_G2, R_BE2
    return w_blob, vec_blob


def gpt_block_pallas(x, params):
    B, S, D = x.shape
    w_blob, vec_blob = pack_params(params)
    xf = x.reshape(B * S, D)                                    # all rows in one kernel step
    kernel = functools.partial(gpt_block_kernel, seq=S, n_heads=N_HEADS)
    # Single-step call (no grid): at B*S=16 the ~0.35us/step pipeline overhead of a grid
    # would dominate.  TODO(synk): at larger B*S add a row-tile grid axis
    # (dimension_semantics=("parallel",), constant index_map for the two slabs) and a
    # flash-style attention tiling sized against v7x's 64 MiB VMEM.
    out = pl.pallas_call(
        kernel,
        out_shape=jax.ShapeDtypeStruct((B * S, D), x.dtype),
    )(xf, w_blob, vec_blob)
    return out.reshape(B, S, D)


def make_params(key, d_model):
    ks = jax.random.split(key, 8)
    scale = 0.02
    p = {}
    # attention projections: stored as (in, out), i.e. already transposed vs torch
    p["wq"] = scale * jax.random.normal(ks[0], (d_model, d_model), jnp.float32)
    p["wk"] = scale * jax.random.normal(ks[1], (d_model, d_model), jnp.float32)
    p["wv"] = scale * jax.random.normal(ks[2], (d_model, d_model), jnp.float32)
    p["wo"] = scale * jax.random.normal(ks[3], (d_model, d_model), jnp.float32)
    p["bq"] = 0.01 * jnp.ones((1, d_model), jnp.float32)
    p["bk"] = -0.01 * jnp.ones((1, d_model), jnp.float32)
    p["bv"] = 0.02 * jnp.ones((1, d_model), jnp.float32)
    p["bo"] = jnp.zeros((1, d_model), jnp.float32)
    # layer norms
    p["g1"] = jnp.ones((1, d_model), jnp.float32)
    p["be1"] = jnp.zeros((1, d_model), jnp.float32)
    p["g2"] = jnp.ones((1, d_model), jnp.float32)
    p["be2"] = jnp.zeros((1, d_model), jnp.float32)
    # feed-forward
    p["w1"] = scale * jax.random.normal(ks[4], (d_model, 4 * d_model), jnp.float32)
    p["b1"] = jnp.zeros((1, 4 * d_model), jnp.float32)
    p["w2"] = scale * jax.random.normal(ks[5], (4 * d_model, d_model), jnp.float32)
    p["b2"] = jnp.zeros((1, d_model), jnp.float32)
    return p


def gpt_block_ref(x, params):
    """Pure-JAX reference mirroring the PyTorch forward (eval mode)."""
    B, S, D = x.shape
    H, hd = N_HEADS, D // N_HEADS

    def proj(v, w, b):
        return jnp.einsum("bsd,de->bse", v, w) + b

    q = proj(x, params["wq"], params["bq"]).reshape(B, S, H, hd).transpose(0, 2, 1, 3)
    k = proj(x, params["wk"], params["bk"]).reshape(B, S, H, hd).transpose(0, 2, 1, 3)
    v = proj(x, params["wv"], params["bv"]).reshape(B, S, H, hd).transpose(0, 2, 1, 3)
    scores = jnp.einsum("bhqd,bhkd->bhqk", q, k) / math.sqrt(hd)
    mask = jnp.triu(jnp.ones((S, S), bool), k=1)
    scores = jnp.where(mask[None, None], -jnp.inf, scores)
    w = jax.nn.softmax(scores, axis=-1)
    att = jnp.einsum("bhqk,bhkd->bhqd", w, v).transpose(0, 2, 1, 3).reshape(B, S, D)
    att = proj(att, params["wo"], params["bo"])

    def ln(h, g, b):
        mu = jnp.mean(h, axis=-1, keepdims=True)
        var = jnp.mean((h - mu) ** 2, axis=-1, keepdims=True)
        return (h - mu) / jnp.sqrt(var + LN_EPS) * g + b

    adn = ln(x + att, params["g1"], params["be1"])
    f = proj(adn, params["w1"], params["b1"])
    f = 0.5 * f * (1.0 + lax.erf(f / math.sqrt(2.0)))
    f = proj(f, params["w2"], params["b2"])
    return ln(f + adn, params["g2"], params["be2"])


if __name__ == "__main__":
    key = jax.random.PRNGKey(0)
    kx, kp = jax.random.split(key)
    x = jax.random.normal(kx, (BATCH, SEQ, D_MODEL), jnp.float32)
    params = make_params(kp, D_MODEL)

    out = gpt_block_pallas(x, params)
    out = jax.block_until_ready(out)

    ref = gpt_block_ref(x, params)
    assert out.shape == (BATCH, SEQ, D_MODEL)
    err = float(jnp.max(jnp.abs(out - ref)))
    assert jnp.allclose(out, ref, atol=5e-4, rtol=5e-4), err
    print("KERNEL_OK")
</pallas_src>

<mosaic_0001>
module attributes {stable_mosaic.version = 11 : i64} {
  func.func @gpt_block_kernel(%arg0: memref<16x32xf32, #tpu.memory_space<vmem>>, %arg1: memref<32x512xf32, #tpu.memory_space<vmem>>, %arg2: memref<8x128xf32, #tpu.memory_space<vmem>>, %arg3: memref<16x32xf32, #tpu.memory_space<vmem>>) attributes {dimension_semantics = [], scalar_prefetch = 0 : i64, scratch_operands = 0 : i64, tpu.core_type = #tpu.core_type<tc>} {
    %c0 = arith.constant 0 : index
    %c0_0 = arith.constant 0 : index
    %0 = vector.load %arg0[%c0, %c0_0] : memref<16x32xf32, #tpu.memory_space<vmem>>, vector<16x32xf32>
    %c0_1 = arith.constant 0 : index
    %c256 = arith.constant 256 : index
    %1 = vector.load %arg1[%c0_1, %c256] : memref<32x512xf32, #tpu.memory_space<vmem>>, vector<32x128xf32>
    %cst = arith.constant dense<0.000000e+00> : vector<16x128xf32>
    %2 = tpu.matmul %0, %1, %cst {dimension_numbers = #tpu.dot_dimension_numbers<[1], [0], [0], [1], [0, 0, 1, 1], [], []>} : vector<16x32xf32>, vector<32x128xf32>, vector<16x128xf32> -> vector<16x128xf32>
    %c0_2 = arith.constant 0 : index
    %c0_3 = arith.constant 0 : index
    %3 = vector.load %arg2[%c0_2, %c0_3] : memref<8x128xf32, #tpu.memory_space<vmem>>, vector<1x128xf32>
    %4 = vector.broadcast %3 : vector<1x128xf32> to vector<16x128xf32>
    %5 = arith.addf %2, %4 : vector<16x128xf32>
    %6 = tpu.iota {dimensions = array<i32: 0>} : vector<16x16xi32>
    %7 = tpu.iota {dimensions = array<i32: 1>} : vector<16x16xi32>
    %c3_i32 = arith.constant 3 : i32
    %8 = vector.broadcast %c3_i32 : i32 to vector<16x16xi32>
    %9 = arith.shrui %6, %8 : vector<16x16xi32>
    %c3_i32_4 = arith.constant 3 : i32
    %10 = vector.broadcast %c3_i32_4 : i32 to vector<16x16xi32>
    %11 = arith.shrui %7, %10 : vector<16x16xi32>
    %12 = arith.cmpi sgt, %7, %6 : vector<16x16xi32>
    %13 = arith.cmpi ne, %9, %11 : vector<16x16xi32>
    %14 = arith.ori %12, %13 : vector<16x16xi1>
    %cst_5 = arith.constant -1.000000e+30 : f32
    %cst_6 = arith.constant 0.000000e+00 : f32
    %15 = vector.broadcast %cst_5 : f32 to vector<16x16xf32>
    %16 = vector.broadcast %cst_6 : f32 to vector<16x16xf32>
    %17 = arith.select %14, %15, %16 : vector<16x16xi1>, vector<16x16xf32>
    %18 = vector.extract_strided_slice %5 {offsets = [0, 0], sizes = [16, 8], strides = [1, 1]} : vector<16x128xf32> to vector<16x8xf32>
    %19 = vector.extract_strided_slice %5 {offsets = [0, 8], sizes = [16, 8], strides = [1, 1]} : vector<16x128xf32> to vector<16x8xf32>
    %20 = vector.extract_strided_slice %5 {offsets = [0, 16], sizes = [16, 8], strides = [1, 1]} : vector<16x128xf32> to vector<16x8xf32>
    %21 = vector.extract_strided_slice %5 {offsets = [0, 24], sizes = [16, 8], strides = [1, 1]} : vector<16x128xf32> to vector<16x8xf32>
    %22 = vector.shape_cast %18 : vector<16x8xf32> to vector<1x16x8xf32>
    %23 = vector.shape_cast %19 : vector<16x8xf32> to vector<1x16x8xf32>
    %24 = vector.shape_cast %20 : vector<16x8xf32> to vector<1x16x8xf32>
    %25 = vector.shape_cast %21 : vector<16x8xf32> to vector<1x16x8xf32>
    %26 = tpu.concatenate %22, %23, %24, %25 in 0 : vector<1x16x8xf32>, vector<1x16x8xf32>, vector<1x16x8xf32>, vector<1x16x8xf32> -> vector<4x16x8xf32>
    %27 = vector.extract_strided_slice %5 {offsets = [0, 32], sizes = [16, 8], strides = [1, 1]} : vector<16x128xf32> to vector<16x8xf32>
    %28 = vector.extract_strided_slice %5 {offsets = [0, 40], sizes = [16, 8], strides = [1, 1]} : vector<16x128xf32> to vector<16x8xf32>
    %29 = vector.extract_strided_slice %5 {offsets = [0, 48], sizes = [16, 8], strides = [1, 1]} : vector<16x128xf32> to vector<16x8xf32>
    %30 = vector.extract_strided_slice %5 {offsets = [0, 56], sizes = [16, 8], strides = [1, 1]} : vector<16x128xf32> to vector<16x8xf32>
    %31 = vector.shape_cast %27 : vector<16x8xf32> to vector<1x16x8xf32>
    %32 = vector.shape_cast %28 : vector<16x8xf32> to vector<1x16x8xf32>
    %33 = vector.shape_cast %29 : vector<16x8xf32> to vector<1x16x8xf32>
    %34 = vector.shape_cast %30 : vector<16x8xf32> to vector<1x16x8xf32>
    %35 = tpu.concatenate %31, %32, %33, %34 in 0 : vector<1x16x8xf32>, vector<1x16x8xf32>, vector<1x16x8xf32>, vector<1x16x8xf32> -> vector<4x16x8xf32>
    %36 = vector.extract_strided_slice %5 {offsets = [0, 64], sizes = [16, 8], strides = [1, 1]} : vector<16x128xf32> to vector<16x8xf32>
    %37 = vector.extract_strided_slice %5 {offsets = [0, 72], sizes = [16, 8], strides = [1, 1]} : vector<16x128xf32> to vector<16x8xf32>
    %38 = vector.extract_strided_slice %5 {offsets = [0, 80], sizes = [16, 8], strides = [1, 1]} : vector<16x128xf32> to vector<16x8xf32>
    %39 = vector.extract_strided_slice %5 {offsets = [0, 88], sizes = [16, 8], strides = [1, 1]} : vector<16x128xf32> to vector<16x8xf32>
    %40 = vector.shape_cast %36 : vector<16x8xf32> to vector<1x16x8xf32>
    %41 = vector.shape_cast %37 : vector<16x8xf32> to vector<1x16x8xf32>
    %42 = vector.shape_cast %38 : vector<16x8xf32> to vector<1x16x8xf32>
    %43 = vector.shape_cast %39 : vector<16x8xf32> to vector<1x16x8xf32>
    %44 = tpu.concatenate %40, %41, %42, %43 in 0 : vector<1x16x8xf32>, vector<1x16x8xf32>, vector<1x16x8xf32>, vector<1x16x8xf32> -> vector<4x16x8xf32>
    "tpu.trace_start"() <{level = 10 : i32, message = "hmd,hnd->hmn"}> : () -> ()
    %cst_7 = arith.constant dense<0.000000e+00> : vector<4x16x16xf32>
    %45 = tpu.matmul %26, %35, %cst_7 {dimension_numbers = #tpu.dot_dimension_numbers<[2], [2], [1], [1], [0, 0, 0, 1, 1, 1], [0], [0]>} : vector<4x16x8xf32>, vector<4x16x8xf32>, vector<4x16x16xf32> -> vector<4x16x16xf32>
    "tpu.trace_stop"() : () -> ()
    %46 = vector.shape_cast %17 : vector<16x16xf32> to vector<1x16x16xf32>
    %47 = vector.broadcast %46 : vector<1x16x16xf32> to vector<4x16x16xf32>
    %48 = arith.addf %45, %47 : vector<4x16x16xf32>
    %cst_8 = arith.constant dense<0xFF800000> : vector<4x16xf32>
    %49 = vector.multi_reduction <maximumf>, %48, %cst_8 [2] : vector<4x16x16xf32> to vector<4x16xf32>
    %50 = vector.shape_cast %49 : vector<4x16xf32> to vector<4x16x1xf32>
    %51 = vector.broadcast %50 : vector<4x16x1xf32> to vector<4x16x16xf32>
    %52 = arith.subf %48, %51 : vector<4x16x16xf32>
    %53 = math.exp %52 : vector<4x16x16xf32>
    %cst_9 = arith.constant dense<0.000000e+00> : vector<4x16xf32>
    %54 = vector.multi_reduction <add>, %53, %cst_9 [2] : vector<4x16x16xf32> to vector<4x16xf32>
    %55 = vector.shape_cast %54 : vector<4x16xf32> to vector<4x16x1xf32>
    %56 = tpu.reciprocal %55 {approx = true} : vector<4x16x1xf32> -> vector<4x16x1xf32>
    %57 = vector.broadcast %56 : vector<4x16x1xf32> to vector<4x16x16xf32>
    %58 = arith.mulf %53, %57 : vector<4x16x16xf32>
    "tpu.trace_start"() <{level = 10 : i32, message = "hmn,hnd->hmd"}> : () -> ()
    %cst_10 = arith.constant dense<0.000000e+00> : vector<4x16x8xf32>
    %59 = tpu.matmul %58, %44, %cst_10 {dimension_numbers = #tpu.dot_dimension_numbers<[2], [1], [1], [2], [0, 0, 0, 1, 1, 2], [0], [0]>} : vector<4x16x16xf32>, vector<4x16x8xf32>, vector<4x16x8xf32> -> vector<4x16x8xf32>
    "tpu.trace_stop"() : () -> ()
    %60 = vector.extract_strided_slice %59 {offsets = [0, 0, 0], sizes = [1, 16, 8], strides = [1, 1, 1]} : vector<4x16x8xf32> to vector<1x16x8xf32>
    %61 = vector.shape_cast %60 : vector<1x16x8xf32> to vector<16x8xf32>
    %62 = vector.extract_strided_slice %59 {offsets = [1, 0, 0], sizes = [1, 16, 8], strides = [1, 1, 1]} : vector<4x16x8xf32> to vector<1x16x8xf32>
    %63 = vector.shape_cast %62 : vector<1x16x8xf32> to vector<16x8xf32>
    %64 = vector.extract_strided_slice %59 {offsets = [2, 0, 0], sizes = [1, 16, 8], strides = [1, 1, 1]} : vector<4x16x8xf32> to vector<1x16x8xf32>
    %65 = vector.shape_cast %64 : vector<1x16x8xf32> to vector<16x8xf32>
    %66 = vector.extract_strided_slice %59 {offsets = [3, 0, 0], sizes = [1, 16, 8], strides = [1, 1, 1]} : vector<4x16x8xf32> to vector<1x16x8xf32>
    %67 = vector.shape_cast %66 : vector<1x16x8xf32> to vector<16x8xf32>
    %68 = tpu.concatenate %61, %63, %65, %67 in 1 : vector<16x8xf32>, vector<16x8xf32>, vector<16x8xf32>, vector<16x8xf32> -> vector<16x32xf32>
    %c0_11 = arith.constant 0 : index
    %c384 = arith.constant 384 : index
    %69 = vector.load %arg1[%c0_11, %c384] : memref<32x512xf32, #tpu.memory_space<vmem>>, vector<32x32xf32>
    %cst_12 = arith.constant dense<0.000000e+00> : vector<16x32xf32>
    %70 = tpu.matmul %68, %69, %cst_12 {dimension_numbers = #tpu.dot_dimension_numbers<[1], [0], [0], [1], [0, 0, 1, 1], [], []>} : vector<16x32xf32>, vector<32x32xf32>, vector<16x32xf32> -> vector<16x32xf32>
    %c2 = arith.constant 2 : index
    %c0_13 = arith.constant 0 : index
    %71 = vector.load %arg2[%c2, %c0_13] : memref<8x128xf32, #tpu.memory_space<vmem>>, vector<1x32xf32>
    %72 = vector.broadcast %71 : vector<1x32xf32> to vector<16x32xf32>
    %73 = arith.addf %70, %72 : vector<16x32xf32>
    %74 = arith.addf %0, %73 : vector<16x32xf32>
    %cst_14 = arith.constant dense<0.000000e+00> : vector<16xf32>
    %75 = vector.multi_reduction <add>, %74, %cst_14 [1] : vector<16x32xf32> to vector<16xf32>
    %76 = vector.shape_cast %75 : vector<16xf32> to vector<16x1xf32>
    %cst_15 = arith.constant 3.200000e+01 : f32
    %77 = vector.broadcast %cst_15 : f32 to vector<16x1xf32>
    %78 = arith.divf %76, %77 : vector<16x1xf32>
    %79 = vector.broadcast %78 : vector<16x1xf32> to vector<16x32xf32>
    %80 = arith.subf %74, %79 : vector<16x32xf32>
    %81 = arith.mulf %80, %80 : vector<16x32xf32>
    %cst_16 = arith.constant dense<0.000000e+00> : vector<16xf32>
    %82 = vector.multi_reduction <add>, %81, %cst_16 [1] : vector<16x32xf32> to vector<16xf32>
    %83 = vector.shape_cast %82 : vector<16xf32> to vector<16x1xf32>
    %cst_17 = arith.constant 3.200000e+01 : f32
    %84 = vector.broadcast %cst_17 : f32 to vector<16x1xf32>
    %85 = arith.divf %83, %84 : vector<16x1xf32>
    %86 = vector.broadcast %78 : vector<16x1xf32> to vector<16x32xf32>
    %87 = arith.subf %74, %86 : vector<16x32xf32>
    %cst_18 = arith.constant 9.99999974E-6 : f32
    %88 = vector.broadcast %cst_18 : f32 to vector<16x1xf32>
    %89 = arith.addf %85, %88 : vector<16x1xf32>
    %90 = math.rsqrt %89 : vector<16x1xf32>
    %91 = vector.broadcast %90 : vector<16x1xf32> to vector<16x32xf32>
    %92 = arith.mulf %87, %91 : vector<16x32xf32>
    %c4 = arith.constant 4 : index
    %c0_19 = arith.constant 0 : index
    %93 = vector.load %arg2[%c4, %c0_19] : memref<8x128xf32, #tpu.memory_space<vmem>>, vector<1x32xf32>
    %94 = vector.broadcast %93 : vector<1x32xf32> to vector<16x32xf32>
    %95 = arith.mulf %92, %94 : vector<16x32xf32>
    %c5 = arith.constant 5 : index
    %c0_20 = arith.constant 0 : index
    %96 = vector.load %arg2[%c5, %c0_20] : memref<8x128xf32, #tpu.memory_space<vmem>>, vector<1x32xf32>
    %97 = vector.broadcast %96 : vector<1x32xf32> to vector<16x32xf32>
    %98 = arith.addf %95, %97 : vector<16x32xf32>
    %c0_21 = arith.constant 0 : index
    %c0_22 = arith.constant 0 : index
    %99 = vector.load %arg1[%c0_21, %c0_22] : memref<32x512xf32, #tpu.memory_space<vmem>>, vector<32x128xf32>
    %cst_23 = arith.constant dense<0.000000e+00> : vector<16x128xf32>
    %100 = tpu.matmul %98, %99, %cst_23 {dimension_numbers = #tpu.dot_dimension_numbers<[1], [0], [0], [1], [0, 0, 1, 1], [], []>} : vector<16x32xf32>, vector<32x128xf32>, vector<16x128xf32> -> vector<16x128xf32>
    %c1 = arith.constant 1 : index
    %c0_24 = arith.constant 0 : index
    %101 = vector.load %arg2[%c1, %c0_24] : memref<8x128xf32, #tpu.memory_space<vmem>>, vector<1x128xf32>
    %102 = vector.broadcast %101 : vector<1x128xf32> to vector<16x128xf32>
    %103 = arith.addf %100, %102 : vector<16x128xf32>
    %cst_25 = arith.constant 5.000000e-01 : f32
    %104 = vector.broadcast %cst_25 : f32 to vector<16x128xf32>
    %105 = arith.mulf %104, %103 : vector<16x128xf32>
    %cst_26 = arith.constant 0.707106769 : f32
    %106 = vector.broadcast %cst_26 : f32 to vector<16x128xf32>
    %107 = arith.mulf %103, %106 : vector<16x128xf32>
    %108 = math.erf %107 : vector<16x128xf32>
    %cst_27 = arith.constant 1.000000e+00 : f32
    %109 = vector.broadcast %cst_27 : f32 to vector<16x128xf32>
    %110 = arith.addf %109, %108 : vector<16x128xf32>
    %111 = arith.mulf %105, %110 : vector<16x128xf32>
    %c0_28 = arith.constant 0 : index
    %c128 = arith.constant 128 : index
    %112 = vector.load %arg1[%c0_28, %c128] : memref<32x512xf32, #tpu.memory_space<vmem>>, vector<32x128xf32>
    %cst_29 = arith.constant dense<0.000000e+00> : vector<16x32xf32>
    %113 = tpu.matmul %111, %112, %cst_29 {dimension_numbers = #tpu.dot_dimension_numbers<[1], [1], [0], [0], [0, 0, 1, 0], [], []>} : vector<16x128xf32>, vector<32x128xf32>, vector<16x32xf32> -> vector<16x32xf32>
    %c3 = arith.constant 3 : index
    %c0_30 = arith.constant 0 : index
    %114 = vector.load %arg2[%c3, %c0_30] : memref<8x128xf32, #tpu.memory_space<vmem>>, vector<1x32xf32>
    %115 = vector.broadcast %114 : vector<1x32xf32> to vector<16x32xf32>
    %116 = arith.addf %113, %115 : vector<16x32xf32>
    %117 = arith.addf %116, %98 : vector<16x32xf32>
    %cst_31 = arith.constant dense<0.000000e+00> : vector<16xf32>
    %118 = vector.multi_reduction <add>, %117, %cst_31 [1] : vector<16x32xf32> to vector<16xf32>
    %119 = vector.shape_cast %118 : vector<16xf32> to vector<16x1xf32>
    %cst_32 = arith.constant 3.200000e+01 : f32
    %120 = vector.broadcast %cst_32 : f32 to vector<16x1xf32>
    %121 = arith.divf %119, %120 : vector<16x1xf32>
    %122 = vector.broadcast %121 : vector<16x1xf32> to vector<16x32xf32>
    %123 = arith.subf %117, %122 : vector<16x32xf32>
    %124 = arith.mulf %123, %123 : vector<16x32xf32>
    %cst_33 = arith.constant dense<0.000000e+00> : vector<16xf32>
    %125 = vector.multi_reduction <add>, %124, %cst_33 [1] : vector<16x32xf32> to vector<16xf32>
    %126 = vector.shape_cast %125 : vector<16xf32> to vector<16x1xf32>
    %cst_34 = arith.constant 3.200000e+01 : f32
    %127 = vector.broadcast %cst_34 : f32 to vector<16x1xf32>
    %128 = arith.divf %126, %127 : vector<16x1xf32>
    %129 = vector.broadcast %121 : vector<16x1xf32> to vector<16x32xf32>
    %130 = arith.subf %117, %129 : vector<16x32xf32>
    %cst_35 = arith.constant 9.99999974E-6 : f32
    %131 = vector.broadcast %cst_35 : f32 to vector<16x1xf32>
    %132 = arith.addf %128, %131 : vector<16x1xf32>
    %133 = math.rsqrt %132 : vector<16x1xf32>
    %134 = vector.broadcast %133 : vector<16x1xf32> to vector<16x32xf32>
    %135 = arith.mulf %130, %134 : vector<16x32xf32>
    %c6 = arith.constant 6 : index
    %c0_36 = arith.constant 0 : index
    %136 = vector.load %arg2[%c6, %c0_36] : memref<8x128xf32, #tpu.memory_space<vmem>>, vector<1x32xf32>
    %137 = vector.broadcast %136 : vector<1x32xf32> to vector<16x32xf32>
    %138 = arith.mulf %135, %137 : vector<16x32xf32>
    %c7 = arith.constant 7 : index
    %c0_37 = arith.constant 0 : index
    %139 = vector.load %arg2[%c7, %c0_37] : memref<8x128xf32, #tpu.memory_space<vmem>>, vector<1x32xf32>
    %140 = vector.broadcast %139 : vector<1x32xf32> to vector<16x32xf32>
    %141 = arith.addf %138, %140 : vector<16x32xf32>
    %c0_38 = arith.constant 0 : index
    %c0_39 = arith.constant 0 : index
    %142 = vector.load %arg3[%c0_38, %c0_39] : memref<16x32xf32, #tpu.memory_space<vmem>>, vector<16x32xf32>
    tpu.vector_store %arg3[%c0_38, %c0_39], %141 {strides = array<i32>} : memref<16x32xf32, #tpu.memory_space<vmem>>, vector<16x32xf32>,
    return
  }
}

</mosaic_0001>

<bundles_post_ra>
// kernel: tpu_custom_call.1
= control target key start
LH: loop header
LB: loop body
LE: loop exit
PB: predicated region body
PF: predicated region fallthrough
CT: control target
= control target key end

     0   :  { %8 = vsyncpa [#allocation3], 0  ;;  %s2039_s0 = inlined_call_operand.hbm [shape: f32[16,32], index: 0, kind: input, shape index: {}]   ;;  %s2040_s1 = inlined_call_operand.hbm [shape: f32[32,512], index: 1, kind: input, shape index: {}]   ;;  %s2041_s2 = inlined_call_operand.hbm [shape: f32[8,128], index: 2, kind: input, shape index: {}]   ;;  %s2042_s3 = inlined_call_operand.hbm [shape: f32[16,32], index: 3, kind: output, shape index: {}]  }
   0x1   :  { %9 = vsyncpa [#allocation6], 0 }
   0x2   :  { %10 = vsyncpa [#allocation4], 0  ;;  %s1833_s12 = smov [#allocation5]   ;;  %s1739_s16 = scalar_lea.hbm %s2040_s1, 2048 }
   0x3   :  { %s28_s13 = sshll.u32 %s1833_s12, 4  ;;  %p1740_p0 = scmp.ne.s32.totalorder %s2040_s1, %s1739_s16  ;;  %s29_s13 = int_to_ptr.vmem [resolvable:$true] %s28_s13 }
   0x4   :  { %p1743_p1 = scmp.lt.u32.totalorder %s1739_s16, %s2040_s1 }
   0x6   :  { %p1745_p2 = pnand %p1743_p1, %p1740_p0 }
   0x8   :  { %1748 = shalt.err (!%p1745_p2)
}
   0x9   :  { %s1749_s21 = scalar_lea.vmem %s29_s13, 2048  ;;  %p1754_p4 = scmp.lt.s32.totalorder %s29_s13, %s29_s13 }
   0xa   :  { %p1750_p3 = scmp.ne.s32.totalorder %s29_s13, %s1749_s21  ;;  %p1755_p5 = scmp.lt.s32.totalorder %s1749_s21, %s1749_s21 }
   0xc   :  { %p1756_p6 = por %p1755_p5, %p1754_p4 }
   0xe   :  { %p1757_p7 = pnand %p1756_p6, %p1750_p3 }
  0x10   :  { %1760 = shalt.err (!%p1757_p7)
}
  0x11   :  { %s1834_s22 = smov 512   ;;  %s1835_s23 = smov 32  }
  0x12   :  { %34 = dma.hbm_to_vmem [thread:$0]  %s2040_s1, 2048, %s29_s13, [#allocation6], %s1834_s22, %s1834_s22, %s1835_s23  }
  0x13   :  { %s1836_s26 = smov [#allocation2]   ;;  %s1761_s30 = scalar_lea.hbm %s2039_s0, 256 }
  0x14   :  { %s16_s27 = sshll.u32 %s1836_s26, 4  ;;  %p1762_p8 = scmp.ne.s32.totalorder %s2039_s0, %s1761_s30  ;;  %s17_s27 = int_to_ptr.vmem [resolvable:$true] %s16_s27 }
  0x15   :  { %p1765_p9 = scmp.lt.u32.totalorder %s1761_s30, %s2039_s0 }
  0x17   :  { %p1767_p10 = pnand %p1765_p9, %p1762_p8 }
  0x19   :  { %1770 = shalt.err (!%p1767_p10)
}
  0x1a   :  { %s1771_s8 = scalar_lea.vmem %s17_s27, 256  ;;  %p1776_p12 = scmp.lt.s32.totalorder %s17_s27, %s17_s27 }
  0x1b   :  { %p1772_p11 = scmp.ne.s32.totalorder %s17_s27, %s1771_s8  ;;  %p1777_p13 = scmp.lt.s32.totalorder %s1771_s8, %s1771_s8 }
  0x1d   :  { %p1778_p0 = por %p1777_p13, %p1776_p12 }
  0x1f   :  { %p1779_p1 = pnand %p1778_p0, %p1772_p11 }
  0x21   :  { %1782 = shalt.err (!%p1779_p1)
}
  0x22   :  { %s1837_s1 = smov 128   ;;  %s1838_s9 = smov 8  }
  0x23   :  { %22 = dma.hbm_to_vmem [thread:$0]  %s2039_s0, 256, %s17_s27, [#allocation3], %s1837_s1, %s1837_s1, %s1838_s9  }
  0x24   :  { %s1839_s12 = smov [#allocation7]   ;;  %s1783_s16 = scalar_lea.hbm %s2041_s2, 128 }
  0x25   :  { %s41_s13 = sshll.u32 %s1839_s12, 4  ;;  %p1784_p2 = scmp.ne.s32.totalorder %s2041_s2, %s1783_s16  ;;  %s42_s13 = int_to_ptr.vmem [resolvable:$true] %s41_s13 }
  0x26   :  { %p1787_p3 = scmp.lt.u32.totalorder %s1783_s16, %s2041_s2 }
  0x28   :  { %p1789_p4 = pnand %p1787_p3, %p1784_p2 }
  0x2a   :  { %1792 = shalt.err (!%p1789_p4)
}
  0x2b   :  { %s1793_s21 = scalar_lea.vmem %s42_s13, 128  ;;  %p1798_p6 = scmp.lt.s32.totalorder %s42_s13, %s42_s13 }
  0x2c   :  { %p1794_p5 = scmp.ne.s32.totalorder %s42_s13, %s1793_s21  ;;  %p1799_p7 = scmp.lt.s32.totalorder %s1793_s21, %s1793_s21 }
  0x2e   :  { %p1800_p8 = por %p1799_p7, %p1798_p6 }
  0x30   :  { %p1801_p9 = pnand %p1800_p8, %p1794_p5 }
  0x32   :  { %1804 = shalt.err (!%p1801_p9)
}
  0x33   :  { %44 = dma.hbm_to_vmem [thread:$0]  %s2041_s2, 128, %s42_s13, [#allocation6]  }
  0x34   :  { %1827 = dma.done.wait [#allocation3], 256  }
  0x35   :  { %1828 = vsyncadd [#allocation3], 4294967040 }
  0x36   :  { %1829 = dma.done.wait [#allocation6], 2176  }
  0x37   :  { %1830 = vsyncadd [#allocation6], 4294965120  ;;  %vm65_vm0 = vcmask 261120   ;;  %v56_v0 = vld [vmem:[#allocation5 + $0x10] sm:$0xff]  ;;  %v1912_v7 = vld [vmem:[#allocation2 + $0x8] sm:$0xff]  ;;  %vm181_vm1 = vcmask 64512   ;;  %v147_v40 = vlaneseq }
  0x38   :  { %v57_v1 = vld [vmem:[#allocation5 + $0x30] sm:$0xff]  ;;  %v1373_v8 = vld [vmem:[#allocation7] ss:$0 sm:$0xff]  ;;  %s1840_s2 = smov 112   ;;  %s1841_s23 = smov 120   ;;  %vm1932_vm2 = vmpackc.low %vm181_vm1, %vm181_vm1  ;;  %v1844_v47 = vmov 0.0  }
  0x39   :  { %v58_v2 = vld [vmem:[#allocation5 + $0x50] sm:$0xff]  ;;  %v1567_v3 = vpack.c.bf16 %v57_v1, %v56_v0  ;;  %s1842_s24 = smov 104   ;;  %s1843_s25 = smov 96   ;;  %v148_v41 = vshrl.u32 %v147_v40, 7  ;;  %v151_v43 = vand.u32 127, %v147_v40  ;;  %vm526_vm9 = vcmask 130048  }
  0x3a   :  { %v59_v4 = vld [vmem:[#allocation5 + $0x70] sm:$0xff]  ;;  %s1845_s26 = smov 64   ;;  %s1846_s27 = smov 16   ;;  %vm991_vm10 = vcmask 195584  }
  0x3b   :  { %v1908_v5 = vld [vmem:[#allocation2] sm:$0xff]  ;;  %v1571_v6 = vpack.c.bf16 %v59_v4, %v58_v2  ;;  %1568 = vmatprep.subr.bf16.mxu1 %v1567_v3  ;;  %v149_v42 = vadd.s32 8, %v148_v41  ;;  %v154_v45 = vshrl.u32 %v151_v43, 3  ;;  %v152_v46 = vshrl.u32 %v148_v41, 3  ;;  %s1847_s28 = smov 24   ;;  %s1848_s29 = smov [#allocation8]  }
  0x3c   :  { %1475 = vmatprep.mubr.msk.f32.mxu1 %vm65_vm0, %v1908_v5  ;;  %1570 = vmatpush3.bf16.msra.mxu1 %v1567_v3  ;;  %vm155_vm5 = vcmp.gt.s32.totalorder %v151_v43, %v148_v41  ;;  %s1360_s30 = sshll.u32 %s1848_s29, 4  ;;  %s1361_s30 = int_to_ptr.vmem [resolvable:$true] %s1360_s30 }
  0x3d   :  { %1572 = vmatprep.subr.bf16.mxu1 %v1571_v6  ;;  %v153_v44 = vshrl.u32 %v149_v42, 3  ;;  %vm156_vm3 = vcmp.gt.s32.totalorder %v151_v43, %v149_v42  ;;  %vm157_vm6 = vcmp.ne.s32.totalorder %v152_v46, %v154_v45  ;;  %s1805_s4 = scalar_lea.vmem %s1361_s30, 256  ;;  %p1810_p11 = scmp.lt.s32.totalorder %s1361_s30, %s1361_s30 }
  0x3e   :  { %vm159_vm8 = vmor %vm155_vm5, %vm157_vm6  ;;  %p1806_p10 = scmp.ne.s32.totalorder %s1361_s30, %s1805_s4  ;;  %p1811_p12 = scmp.lt.s32.totalorder %s1805_s4, %s1805_s4 }
  0x3f   :  { %vm158_vm4 = vcmp.ne.s32.totalorder %v153_v44, %v154_v45  ;;  %v161_v49 = vsel %vm159_vm8, -1e+30, %v1844_v47 }
  0x40   :  { %1574 = vmatpush3.bf16.msra.mxu1 %v1571_v6  ;;  %vm160_vm7 = vmor %vm156_vm3, %vm158_vm4  ;;  %p1812_p13 = por %p1811_p12, %p1810_p11 }
  0x41   :  { %v162_v48 = vsel %vm160_vm7, -1e+30, %v1844_v47 }
  0x42   :  { %p1813_p0 = pnand %p1812_p13, %p1806_p10 }
  0x43   :  { %1476 = vmatmul.mubr.msk.f32.vlgmr.msra.gmra.mrb[0].mxu1 %vm65_vm0, %v1912_v7 }
 0x116   :  { %v1477_v9 = vpop.f32.mrb[0].mxu1 }
 0x117   :  { %v144_v10 = vadd.f32 %v1477_v9, %v1373_v8  ;;  %v138_v11 = vpop.f32.mrb[1].mxu1 }
 0x118   :  { %v139_v12 = vadd.f32 %v1373_v8, %v138_v11 }
 0x119   :  { %171 = vrot.lane.b32.xlu1 %v144_v10, %s1840_s2 }
 0x11a   :  { %165 = vrot.lane.b32.xlu0 %v139_v12, %s1841_s23  ;;  %1482 = vmatprep.mubr.msk.f32.mxu1 %vm181_vm1, %v139_v12  ;;  %v1917_v13 = vpack.i.bf16 %v144_v10, %v139_v12 }
 0x11d   :  { %169 = vrot.lane.b32.xlu1 %v139_v12, %s1840_s2 }
 0x11e   :  { %167 = vrot.lane.b32.xlu0 %v144_v10, %s1841_s23 }
 0x121   :  { %175 = vrot.lane.b32.xlu1 %v144_v10, %s1842_s24 }
 0x122   :  { %173 = vrot.lane.b32.xlu0 %v139_v12, %s1842_s24 }
 0x126   :  { %1656 = vrot.lane.b32.xlu0 %v1917_v13, %s1843_s25 }
 0x18b   :  { %v172_v14 = vpop.permute.xlu1 %171 }
 0x18c   :  { %v166_v15 = vpop.permute.xlu0 %165 }
 0x18d   :  { %1489 = vmatprep.mubr.msk.f32.mxu0 %vm181_vm1, %v166_v15 }
 0x18f   :  { %v170_v16 = vpop.permute.xlu1 %169 }
 0x190   :  { %v1921_v17 = vpack.i.bf16 %v172_v14, %v170_v16  ;;  %v168_v18 = vpop.permute.xlu0 %167 }
 0x191   :  { %v1923_v19 = vpack.i.bf16 %v168_v18, %v166_v15 }
 0x192   :  { %1666 = vrot.lane.b32.xlu0 %v1921_v17, %s1843_s25 }
 0x193   :  { %v176_v20 = vpop.permute.xlu1 %175  ;;  %1661 = vrot.lane.b32.xlu1 %v1923_v19, %s1843_s25 }
 0x194   :  { %v174_v21 = vpop.permute.xlu0 %173 }
 0x195   :  { %v1927_v22 = vpack.i.bf16 %v176_v20, %v174_v21 }
 0x197   :  { %1671 = vrot.lane.b32.xlu1 %v1927_v22, %s1843_s25 }
 0x198   :  { %v1657_v23 = vpop.permute.xlu0 %1656 }
 0x199   :  { %v1659_v24 = vunpack.i.h.bf16 %v1657_v23  ;;  %v1658_v25 = vunpack.i.l.bf16 %v1657_v23 }
 0x19b   :  { %v1575_v27 = vpack.c.bf16 %v1659_v24, %v1658_v25 }
 0x19d   :  { %1577 = vmatprep.subr.msk.bf16.mxu1 %vm1932_vm2, %v1575_v27 }
 0x19e   :  { %1580 = vmatpush3.bf16.xpose.msk.msra.mxu1 %vm1932_vm2, %v1575_v27 }
 0x1a5   :  { %1483 = vmatmul.mubr.msk.f32.vlgmr.msra.gmra.mrb[2].mxu1 %vm181_vm1, %v144_v10 }
 0x1a6   :  { %1496 = vmatprep.mubr.msk.f32.mxu1 %vm181_vm1, %v170_v16 }
 0x204   :  { %v1667_v28 = vpop.permute.xlu0 %1666 }
 0x205   :  { %v1669_v29 = vunpack.i.h.bf16 %v1667_v28  ;;  %v1668_v30 = vunpack.i.l.bf16 %v1667_v28  ;;  %v1662_v31 = vpop.permute.xlu1 %1661 }
 0x206   :  { %v1664_v32 = vunpack.i.h.bf16 %v1662_v31  ;;  %v1663_v33 = vunpack.i.l.bf16 %v1662_v31 }
 0x207   :  { %v1587_v34 = vpack.c.bf16 %v1669_v29, %v1668_v30 }
 0x208   :  { %v1581_v35 = vpack.c.bf16 %v1664_v32, %v1663_v33 }
 0x209   :  { %v1672_v36 = vpop.permute.xlu1 %1671  ;;  %1589 = vmatprep.subr.msk.bf16.mxu1 %vm1932_vm2, %v1587_v34 }
 0x20a   :  { %v1674_v37 = vunpack.i.h.bf16 %v1672_v36  ;;  %v1673_v38 = vunpack.i.l.bf16 %v1672_v36  ;;  %1583 = vmatprep.subr.msk.bf16.mxu0 %vm1932_vm2, %v1581_v35  ;;  %1592 = vmatpush3.bf16.xpose.msk.msra.mxu1 %vm1932_vm2, %v1587_v34 }
 0x20b   :  { %1586 = vmatpush3.bf16.xpose.msk.msra.mxu0 %vm1932_vm2, %v1581_v35 }
 0x20c   :  { %v1593_v39 = vpack.c.bf16 %v1674_v37, %v1673_v38 }
 0x20e   :  { %1595 = vmatprep.subr.msk.bf16.mxu0 %vm1932_vm2, %v1593_v39 }
 0x211   :  { %1497 = vmatmul.mubr.msk.f32.vlgmr.msra.gmra.mrb[4].mxu1 %vm181_vm1, %v172_v14 }
 0x212   :  { %1490 = vmatmul.mubr.msk.f32.vlgmr.msra.gmra.mrb[0].mxu0 %vm181_vm1, %v168_v18 }
 0x213   :  { %1598 = vmatpush3.bf16.xpose.msk.msra.mxu0 %vm1932_vm2, %v1593_v39  ;;  %1503 = vmatprep.mubr.msk.f32.mxu0 %vm181_vm1, %v174_v21 }
 0x21a   :  { %1504 = vmatmul.mubr.msk.f32.vlgmr.msra.gmra.mrb[2].mxu0 %vm181_vm1, %v176_v20 }
 0x278   :  { %v1484_v50 = vpop.f32.mrb[2].mxu1 }
 0x279   :  { %v262_v51 = vadd.f32 %v1484_v50, %v162_v48  ;;  %v256_v52 = vpop.f32.mrb[3].mxu1 }
 0x27a   :  { %v257_v53 = vadd.f32 %v256_v52, %v161_v49 }
 0x27b   :  { %v530_v54 = vsel %vm526_vm9, %v262_v51, -inf }
 0x27c   :  { %531 = vmax.xlane.f32.xlu1 %v530_v54  ;;  %v527_v55 = vsel %vm526_vm9, %v257_v53, -inf }
 0x27d   :  { %528 = vmax.xlane.f32.xlu0 %v527_v55 }
 0x2e4   :  { %v1498_v56 = vpop.f32.mrb[4].mxu1 }
 0x2e5   :  { %v1491_v57 = vpop.f32.mrb[0].mxu0  ;;  %v430_v58 = vpop.f32.mrb[5].mxu1  ;;  %v436_v1 = vadd.f32 %v1498_v56, %v162_v48 }
 0x2e6   :  { %v349_v59 = vadd.f32 %v1491_v57, %v162_v48  ;;  %v431_v60 = vadd.f32 %v430_v58, %v161_v49  ;;  %v343_v61 = vpop.f32.mrb[1].mxu0 }
 0x2e7   :  { %v344_v62 = vadd.f32 %v343_v61, %v161_v49  ;;  %v542_v9 = vsel %vm526_vm9, %v436_v1, -inf }
 0x2e8   :  { %v539_v63 = vsel %vm526_vm9, %v431_v60, -inf  ;;  %v536_v0 = vsel %vm526_vm9, %v349_v59, -inf }
 0x2e9   :  { %540 = vmax.xlane.f32.xlu1 %v539_v63  ;;  %537 = vmax.xlane.f32.xlu0 %v536_v0  ;;  %v533_v2 = vsel %vm526_vm9, %v344_v62, -inf }
 0x2ed   :  { %v1505_v3 = vpop.f32.mrb[2].mxu0  ;;  %534 = vmax.xlane.f32.xlu0 %v533_v2 }
 0x2ee   :  { %v517_v4 = vpop.f32.mrb[3].mxu0  ;;  %v523_v8 = vadd.f32 %v1505_v3, %v162_v48 }
 0x2ef   :  { %v1963_v6 = vadd.f32 %v517_v4, %v161_v49 }
 0x2f0   :  { %v548_v11 = vsel %vm526_vm9, %v523_v8, -inf }
 0x2f1   :  { %543 = vmax.xlane.f32.xlu0 %v542_v9  ;;  %v545_v10 = vsel %vm526_vm9, %v1963_v6, -inf }
 0x2f2   :  { %546 = vmax.xlane.f32.xlu1 %v545_v10 }
 0x2f5   :  { %549 = vmax.xlane.f32.xlu0 %v548_v11 }
 0x303   :  { %1676 = vrot.lane.b32.xlu1 %v1917_v13, %s1845_s26 }
 0x309   :  { %v532_v12 = vpop.xlane.xlu1 %531 }
 0x30a   :  { %v552_v14 = vsub.f32 %v262_v51, %v532_v12  ;;  %v529_v16 = vpop.xlane.xlu0 %528 }
 0x30b   :  { %v551_v18 = vsub.f32 %v257_v53, %v529_v16 }
 0x30c   :  { %v561_v15 = vmul.f32 1.442695, %v552_v14 }
 0x30d   :  { %v559_v20 = vmul.f32 1.442695, %v551_v18 }
 0x30e   :  { %1695 = vpow2.f32 %v561_v15 }
 0x30f   :  { %1697 = vpow2.f32 %v559_v20 }
 0x318   :  { %v1696_v21 = vpop.eup %1695 }
 0x319   :  { %v578_v23 = vsel %vm526_vm9, %v1696_v21, 0.0  ;;  %v1698_v24 = vpop.eup %1697 }
 0x31a   :  { %579 = vadd.xlane.f32.xlu0 %v578_v23  ;;  %v575_v25 = vsel %vm526_vm9, %v1698_v24, 0.0 }
 0x327   :  { %576 = vadd.xlane.f32.xlu1 %v575_v25 }
 0x376   :  { %v541_v26 = vpop.xlane.xlu1 %540  ;;  %v538_v27 = vpop.xlane.xlu0 %537 }
 0x377   :  { %v554_v28 = vsub.f32 %v349_v59, %v538_v27  ;;  %v555_v13 = vsub.f32 %v431_v60, %v541_v26 }
 0x379   :  { %v565_v29 = vmul.f32 1.442695, %v554_v28  ;;  %v567_v32 = vmul.f32 1.442695, %v555_v13 }
 0x37a   :  { %v535_v30 = vpop.xlane.xlu0 %534 }
 0x37b   :  { %v553_v31 = vsub.f32 %v344_v62, %v535_v30  ;;  %1699 = vpow2.f32 %v565_v29 }
 0x37d   :  { %v563_v33 = vmul.f32 1.442695, %v553_v31 }
 0x37e   :  { %v544_v34 = vpop.xlane.xlu0 %543 }
 0x37f   :  { %1701 = vpow2.f32 %v563_v33  ;;  %v556_v35 = vsub.f32 %v436_v1, %v544_v34  ;;  %v547_v36 = vpop.xlane.xlu1 %546 }
 0x380   :  { %1703 = vpow2.f32 %v567_v32  ;;  %v557_v55 = vsub.f32 %v1963_v6, %v547_v36  ;;  %v995_v36 = vld [vmem:[#allocation5 + $0x38] sm:$0xff] }
 0x381   :  { %v569_v37 = vmul.f32 1.442695, %v556_v35  ;;  %v994_v35 = vld [vmem:[#allocation5 + $0x18] sm:$0xff] }
 0x382   :  { %v550_v38 = vpop.xlane.xlu0 %549  ;;  %v571_v57 = vmul.f32 1.442695, %v557_v55 }
 0x383   :  { %1705 = vpow2.f32 %v569_v37  ;;  %v558_v39 = vsub.f32 %v523_v8, %v550_v38  ;;  %v1677_v40 = vpop.permute.xlu1 %1676  ;;  %v996_v37 = vld [vmem:[#allocation5 + $0x58] sm:$0xff]  ;;  %v1615_v38 = vpack.c.bf16 %v995_v36, %v994_v35  ;;  %v1227_v36 = vld [vmem:[#allocation5 + $0x8] sm:$0xff] }
 0x384   :  { %v1679_v41 = vunpack.i.h.bf16 %v1677_v40  ;;  %v1678_v42 = vunpack.i.l.bf16 %v1677_v40 }
 0x385   :  { %v573_v43 = vmul.f32 1.442695, %v558_v39  ;;  %v1973_v44 = vpop.eup %1699  ;;  %v997_v39 = vld [vmem:[#allocation5 + $0x78] sm:$0xff] }
 0x386   :  { %v1599_v45 = vpack.c.bf16 %v1679_v41, %v1678_v42  ;;  %v584_v46 = vsel %vm526_vm9, %v1973_v44, 0.0  ;;  %v1619_v40 = vpack.c.bf16 %v997_v39, %v996_v37  ;;  %v1228_v37 = vld [vmem:[#allocation5 + $0x28] sm:$0xff] }
 0x387   :  { %1707 = vpow2.f32 %v573_v43  ;;  %585 = vadd.xlane.f32.xlu0 %v584_v46  ;;  %v1229_v39 = vld [vmem:[#allocation5 + $0x48] sm:$0xff] }
 0x388   :  { %1600 = vmatprep.subr.bf16.mxu1 %v1599_v45 }
 0x389   :  { %v1702_v47 = vpop.eup %1701  ;;  %1602 = vmatpush3.bf16.msra.mxu1 %v1599_v45 }
 0x38a   :  { %v581_v48 = vsel %vm526_vm9, %v1702_v47, 0.0  ;;  %v1704_v49 = vpop.eup %1703 }
 0x38b   :  { %582 = vadd.xlane.f32.xlu1 %v581_v48  ;;  %v587_v51 = vsel %vm526_vm9, %v1704_v49, 0.0 }
 0x38d   :  { %v1706_v50 = vpop.eup %1705 }
 0x38e   :  { %v590_v52 = vsel %vm526_vm9, %v1706_v50, 0.0 }
 0x38f   :  { %588 = vadd.xlane.f32.xlu1 %v587_v51  ;;  %591 = vadd.xlane.f32.xlu0 %v590_v52 }
 0x391   :  { %v1980_v53 = vpop.eup %1707 }
 0x392   :  { %v596_v54 = vsel %vm526_vm9, %v1980_v53, 0.0 }
 0x393   :  { %597 = vadd.xlane.f32.xlu0 %v596_v54 }
 0x3a0   :  { %1686 = vrot.lane.b32.xlu1 %v1921_v17, %s1845_s26 }
 0x3a7   :  { %v580_v56 = vpop.xlane.xlu0 %579 }
 0x3a8   :  { %1709 = vrcp.f32 %v580_v56 }
 0x3a9   :  { %1681 = vrot.lane.b32.xlu0 %v1923_v19, %s1845_s26 }
 0x3b2   :  { %v1710_v59 = vpop.eup %1709 }
 0x3b3   :  { %v608_v63 = vmul.f32 %v1710_v59, %v1696_v21  ;;  %v1400_v59 = vld [vmem:[#allocation7 + $0x2] ss:$0 sm:$0xff] }
 0x3b4   :  { %v577_v58 = vpop.xlane.xlu1 %576 }
 0x3b5   :  { %1711 = vrcp.f32 %v577_v58 }
 0x3b6   :  { %1713 = vpow2.f32 %v571_v57 }
 0x3bf   :  { %v1712_v60 = vpop.eup %1711 }
 0x3c0   :  { %v1714_v61 = vpop.eup %1713  ;;  %v607_v62 = vmul.f32 %v1712_v60, %v1698_v24 }
 0x3c1   :  { %v593_v17 = vsel %vm526_vm9, %v1714_v61, 0.0 }
 0x3c2   :  { %1510 = vmatprep.mubr.msk.f32.mxu1 %vm526_vm9, %v607_v62 }
 0x3c3   :  { %1511 = vmatmul.mubr.msk.f32.vlgmr.msra.gmra.mrb[6].mxu1 %vm526_vm9, %v608_v63 }
 0x3c4   :  { %594 = vadd.xlane.f32.xlu1 %v593_v17 }
 0x3d5   :  { %1691 = vrot.lane.b32.xlu1 %v1927_v22, %s1845_s26 }
 0x414   :  { %v586_v19 = vpop.xlane.xlu0 %585 }
 0x418   :  { %v583_v0 = vpop.xlane.xlu1 %582 }
 0x419   :  { %1715 = vrcp.f32 %v583_v0 }
 0x41a   :  { %1717 = vrcp.f32 %v586_v19 }
 0x41c   :  { %v589_v1 = vpop.xlane.xlu1 %588  ;;  %v592_v2 = vpop.xlane.xlu0 %591 }
 0x41d   :  { %1719 = vrcp.f32 %v589_v1 }
 0x41e   :  { %1721 = vrcp.f32 %v592_v2 }
 0x420   :  { %v1687_v3 = vpop.permute.xlu1 %1686  ;;  %v598_v4 = vpop.xlane.xlu0 %597 }
 0x421   :  { %v1689_v6 = vunpack.i.h.bf16 %v1687_v3  ;;  %v1688_v8 = vunpack.i.l.bf16 %v1687_v3  ;;  %1723 = vrcp.f32 %v598_v4 }
 0x423   :  { %v1716_v9 = vpop.eup %1715  ;;  %v1607_v10 = vpack.c.bf16 %v1689_v6, %v1688_v8 }
 0x424   :  { %v1682_v11 = vpop.permute.xlu0 %1681  ;;  %v609_v12 = vmul.f32 %v1716_v9, %v1702_v47  ;;  %v1718_v22 = vpop.eup %1717 }
 0x425   :  { %v1684_v14 = vunpack.i.h.bf16 %v1682_v11  ;;  %v1683_v15 = vunpack.i.l.bf16 %v1682_v11  ;;  %1608 = vmatprep.subr.bf16.mxu0 %v1607_v10  ;;  %v610_v24 = vmul.f32 %v1718_v22, %v1973_v44  ;;  %v1129_v22 = vld [vmem:[#allocation5 + $0x40] sm:$0xff] }
 0x426   :  { %1517 = vmatprep.mubr.msk.f32.mxu1 %vm526_vm9, %v609_v12  ;;  %1610 = vmatpush3.bf16.msra.mxu0 %v1607_v10 }
 0x427   :  { %v1720_v16 = vpop.eup %1719  ;;  %v1603_v18 = vpack.c.bf16 %v1684_v14, %v1683_v15  ;;  %1616 = vmatprep.subr.bf16.mxu0 %v1615_v38  ;;  %v1128_v14 = vld [vmem:[#allocation5 + $0x20] sm:$0xff] }
 0x428   :  { %v1722_v20 = vpop.eup %1721  ;;  %v611_v21 = vmul.f32 %v1720_v16, %v1704_v49  ;;  %v1130_v16 = vld [vmem:[#allocation5 + $0x60] sm:$0xff] }
 0x429   :  { %v612_v23 = vmul.f32 %v1722_v20, %v1706_v50  ;;  %1604 = vmatprep.subr.bf16.mxu1 %v1603_v18 }
 0x42a   :  { %1606 = vmatpush3.bf16.msra.mxu1 %v1603_v18  ;;  %1524 = vmatprep.mubr.msk.f32.mxu0 %vm526_vm9, %v611_v21  ;;  %v1627_v18 = vpack.c.bf16 %v1130_v16, %v1129_v22 }
 0x42b   :  { %1525 = vmatmul.mubr.msk.f32.vlgmr.msra.gmra.mrb[4].mxu0 %vm526_vm9, %v612_v23  ;;  %v1724_v29 = vpop.eup %1723 }
 0x42c   :  { %v614_v32 = vmul.f32 %v1724_v29, %v1980_v53  ;;  %1618 = vmatpush3.bf16.msra.mxu0 %v1615_v38  ;;  %v1404_v29 = vld [vmem:[#allocation7 + $0x5] ss:$0 sm:$0xff]  ;;  %v1631_v38 = vpack.c.bf16 %v1228_v37, %v1227_v36 }
 0x42d   :  { %1518 = vmatmul.mubr.msk.f32.vlgmr.msra.gmra.mrb[8].mxu1 %vm526_vm9, %v610_v24  ;;  %1620 = vmatprep.subr.bf16.mxu0 %v1619_v40 }
 0x430   :  { %1622 = vmatpush3.bf16.msra.mxu0 %v1619_v40  ;;  %v1230_v40 = vld [vmem:[#allocation5 + $0x68] sm:$0xff] }
 0x431   :  { %1632 = vmatprep.subr.bf16.mxu0 %v1631_v38 }
 0x451   :  { %v595_v25 = vpop.xlane.xlu1 %594 }
 0x452   :  { %1725 = vrcp.f32 %v595_v25 }
 0x455   :  { %v1692_v26 = vpop.permute.xlu1 %1691 }
 0x456   :  { %v1694_v27 = vunpack.i.h.bf16 %v1692_v26  ;;  %v1693_v28 = vunpack.i.l.bf16 %v1692_v26 }
 0x458   :  { %v1611_v13 = vpack.c.bf16 %v1694_v27, %v1693_v28  ;;  %v1403_v28 = vld [vmem:[#allocation7 + $0x4] ss:$0 sm:$0xff] }
 0x45a   :  { %1612 = vmatprep.subr.bf16.mxu1 %v1611_v13 }
 0x45b   :  { %1614 = vmatpush3.bf16.msra.mxu1 %v1611_v13 }
 0x45c   :  { %v1726_v30 = vpop.eup %1725 }
 0x45d   :  { %v613_v31 = vmul.f32 %v1726_v30, %v1714_v61 }
 0x45f   :  { %1531 = vmatprep.mubr.msk.f32.mxu1 %vm526_vm9, %v613_v31 }
 0x460   :  { %1532 = vmatmul.mubr.msk.f32.vlgmr.msra.gmra.mrb[10].mxu1 %vm526_vm9, %v614_v32 }
 0x496   :  { %v1512_v33 = vpop.f32.mrb[6].mxu1 }
 0x497   :  { %v693_v34 = vpop.f32.mrb[7].mxu1 }
 0x4fe   :  { %v1526_v41 = vpop.f32.mrb[4].mxu0 }
 0x4ff   :  { %v867_v42 = vpop.f32.mrb[5].mxu0 }
 0x500   :  { %v1519_v43 = vpop.f32.mrb[8].mxu1 }
 0x501   :  { %967 = vrot.lane.b32.xlu1 %v1519_v43, %s1838_s9  ;;  %v780_v44 = vpop.f32.mrb[9].mxu1 }
 0x502   :  { %965 = vrot.lane.b32.xlu0 %v780_v44, %s1838_s9 }
 0x505   :  { %975 = vrot.lane.b32.xlu1 %v1526_v41, %s1846_s27  ;;  %v1635_v41 = vpack.c.bf16 %v1230_v40, %v1229_v39 }
 0x506   :  { %973 = vrot.lane.b32.xlu0 %v867_v42, %s1846_s27  ;;  %v1405_v42 = vld [vmem:[#allocation7 + $0x1] ss:$0 sm:$0xff] }
 0x533   :  { %v1533_v45 = vpop.f32.mrb[10].mxu1 }
 0x534   :  { %983 = vrot.lane.b32.xlu1 %v1533_v45, %s1847_s28  ;;  %v954_v46 = vpop.f32.mrb[11].mxu1 }
 0x535   :  { %981 = vrot.lane.b32.xlu0 %v954_v46, %s1847_s28 }
 0x573   :  { %v968_v47 = vpop.permute.xlu1 %967 }
 0x574   :  { %v966_v48 = vpop.permute.xlu0 %965  ;;  %v988_v53 = vsel %vm181_vm1, %v1512_v33, %v968_v47 }
 0x575   :  { %v987_v51 = vsel %vm181_vm1, %v693_v34, %v966_v48 }
 0x577   :  { %v976_v49 = vpop.permute.xlu1 %975 }
 0x578   :  { %v974_v50 = vpop.permute.xlu0 %973  ;;  %v990_v56 = vsel %vm526_vm9, %v988_v53, %v976_v49 }
 0x579   :  { %v989_v54 = vsel %vm526_vm9, %v987_v51, %v974_v50 }
 0x5a6   :  { %v984_v52 = vpop.permute.xlu1 %983 }
 0x5a7   :  { %v982_v55 = vpop.permute.xlu0 %981  ;;  %v993_v58 = vsel %vm991_vm10, %v990_v56, %v984_v52 }
 0x5a8   :  { %v992_v57 = vsel %vm991_vm10, %v989_v54, %v982_v55 }
 0x5a9   :  { %1542 = vmatprep.mubr.msk.f32.mxu0 %vm65_vm0, %v992_v57  ;;  %v1408_v57 = vld [vmem:[#allocation7 + $0x3] ss:$0 sm:$0xff] }
 0x5aa   :  { %1543 = vmatmul.mubr.msk.f32.vlgmr.msra.gmra.mrb[6].mxu0 %vm65_vm0, %v993_v58 }
 0x5ab   :  { %1634 = vmatpush3.bf16.xpose.msra.mxu0 %v1631_v38 }
 0x5ac   :  { %1636 = vmatprep.subr.bf16.mxu0 %v1635_v41 }
 0x5b3   :  { %1638 = vmatpush3.bf16.xpose.msra.mxu0 %v1635_v41 }
 0x67d   :  { %v1544_v60 = vpop.f32.mrb[6].mxu0 }
 0x67e   :  { %v1081_v61 = vadd.f32 %v1544_v60, %v1400_v59  ;;  %v1075_v62 = vpop.f32.mrb[7].mxu0 }
 0x67f   :  { %v1076_v63 = vadd.f32 %v1400_v59, %v1075_v62 }
 0x680   :  { %v1085_v17 = vadd.f32 %v1081_v61, %v1912_v7 }
 0x681   :  { %v1084_v19 = vadd.f32 %v1076_v63, %v1908_v5  ;;  %v1127_v5 = vld [vmem:[#allocation5] sm:$0xff] }
 0x682   :  { %v1089_v0 = vsel %vm65_vm0, %v1085_v17, 0.0  ;;  %v1623_v15 = vpack.c.bf16 %v1128_v14, %v1127_v5 }
 0x683   :  { %1090 = vadd.xlane.f32.xlu1 %v1089_v0  ;;  %v1086_v1 = vsel %vm65_vm0, %v1084_v19, 0.0 }
 0x684   :  { %1087 = vadd.xlane.f32.xlu0 %v1086_v1  ;;  %1624 = vmatprep.subr.bf16.mxu1 %v1623_v15 }
 0x685   :  { %1626 = vmatpush3.bf16.msra.mxu1 %v1623_v15 }
 0x686   :  { %1628 = vmatprep.subr.bf16.mxu1 %v1627_v18 }
 0x689   :  { %1630 = vmatpush3.bf16.msra.mxu1 %v1627_v18  ;;  %v1409_v18 = vld [vmem:[#allocation7 + $0x6] ss:$0 sm:$0xff] }
 0x710   :  { %v1091_v2 = vpop.xlane.xlu1 %1090 }
 0x711   :  { %v1094_v3 = vmul.f32 0.03125, %v1091_v2  ;;  %v1088_v4 = vpop.xlane.xlu0 %1087 }
 0x712   :  { %v1093_v6 = vmul.f32 0.03125, %v1088_v4 }
 0x713   :  { %v1096_v8 = vsub.f32 %v1085_v17, %v1094_v3 }
 0x714   :  { %v1095_v9 = vsub.f32 %v1084_v19, %v1093_v6 }
 0x715   :  { %v1098_v12 = vmul.f32 %v1096_v8, %v1096_v8 }
 0x716   :  { %v1097_v10 = vmul.f32 %v1095_v9, %v1095_v9 }
 0x717   :  { %v1102_v7 = vsel %vm65_vm0, %v1098_v12, 0.0 }
 0x718   :  { %v1099_v11 = vsel %vm65_vm0, %v1097_v10, 0.0 }
 0x719   :  { %1100 = vadd.xlane.f32.xlu0 %v1099_v11 }
 0x71d   :  { %1103 = vadd.xlane.f32.xlu0 %v1102_v7 }
 0x7a6   :  { %v1101_v20 = vpop.xlane.xlu0 %1100 }
 0x7a7   :  { %v1105_v21 = vmul.f32 0.03125, %v1101_v20 }
 0x7a9   :  { %v1107_v23 = vadd.f32 1e-05, %v1105_v21 }
 0x7aa   :  { %v1104_v24 = vpop.xlane.xlu0 %1103 }
 0x7ab   :  { %1727 = vrsqrt.f32 %v1107_v23  ;;  %v1106_v25 = vmul.f32 0.03125, %v1104_v24  ;;  %v1410_v24 = vld [vmem:[#allocation7 + $0x7] ss:$0 sm:$0xff] }
 0x7ad   :  { %v1108_v26 = vadd.f32 1e-05, %v1106_v25 }
 0x7af   :  { %1729 = vrsqrt.f32 %v1108_v26 }
 0x7b5   :  { %v1728_v27 = vpop.eup %1727 }
 0x7b6   :  { %v1111_v13 = vmul.f32 %v1728_v27, %v1095_v9 }
 0x7b8   :  { %v1118_v30 = vmul.f32 %v1403_v28, %v1111_v13 }
 0x7b9   :  { %v1730_v31 = vpop.eup %1729 }
 0x7ba   :  { %v1112_v32 = vmul.f32 %v1730_v31, %v1096_v8  ;;  %v1125_v33 = vadd.f32 %v1404_v29, %v1118_v30 }
 0x7bc   :  { %v1119_v34 = vmul.f32 %v1403_v28, %v1112_v32  ;;  %1553 = vmatprep.mubr.msk.f32.mxu1 %vm65_vm0, %v1125_v33 }
 0x7be   :  { %v1126_v35 = vadd.f32 %v1404_v29, %v1119_v34 }
 0x7c0   :  { %1554 = vmatmul.mubr.msk.f32.vlgmr.msra.gmra.mrb[12].mxu1 %vm65_vm0, %v1126_v35 }
 0x893   :  { %v1555_v43 = vpop.f32.mrb[12].mxu1 }
 0x894   :  { %v1214_v44 = vadd.f32 %v1555_v43, %v1405_v42  ;;  %v1208_v45 = vpop.f32.mrb[13].mxu1 }
 0x895   :  { %v1209_v46 = vadd.f32 %v1405_v42, %v1208_v45 }
 0x896   :  { %v1220_v47 = vmul.f32 0.70710677, %v1214_v44  ;;  %v1218_v54 = vmul.f32 0.5, %v1214_v44 }
 0x897   :  { %v1219_v48 = vmul.f32 0.70710677, %v1209_v46  ;;  %v1217_v52 = vmul.f32 0.5, %v1209_v46 }
 0x898   :  { %1731 = verf.f32 %v1220_v47 }
 0x899   :  { %1733 = verf.f32 %v1219_v48 }
 0x8a2   :  { %v1732_v49 = vpop.eup %1731 }
 0x8a3   :  { %v1734_v50 = vpop.eup %1733  ;;  %v1224_v51 = vadd.f32 1.0, %v1732_v49 }
 0x8a4   :  { %v1223_v53 = vadd.f32 1.0, %v1734_v50 }
 0x8a5   :  { %v1226_v56 = vmul.f32 %v1224_v51, %v1218_v54 }
 0x8a6   :  { %v1225_v55 = vmul.f32 %v1223_v53, %v1217_v52 }
 0x8a8   :  { %1564 = vmatprep.mubr.f32.mxu0 %v1225_v55 }
 0x8a9   :  { %1565 = vmatmul.mubr.f32.vlgmr.msra.gmra.mrb[8].mxu0 %v1226_v56 }
 0x97c   :  { %v1566_v58 = vpop.f32.mrb[8].mxu0 }
 0x97d   :  { %v1308_v59 = vadd.f32 %v1566_v58, %v1408_v57  ;;  %v1302_v60 = vpop.f32.mrb[9].mxu0 }
 0x97e   :  { %v1303_v61 = vadd.f32 %v1408_v57, %v1302_v60 }
 0x97f   :  { %v1312_v62 = vadd.f32 %v1308_v59, %v1126_v35 }
 0x980   :  { %v1311_v63 = vadd.f32 %v1303_v61, %v1125_v33 }
 0x981   :  { %v1316_v17 = vsel %vm65_vm0, %v1312_v62, 0.0 }
 0x982   :  { %1317 = vadd.xlane.f32.xlu0 %v1316_v17  ;;  %v1313_v19 = vsel %vm65_vm0, %v1311_v63, 0.0 }
 0x983   :  { %1314 = vadd.xlane.f32.xlu1 %v1313_v19 }
 0xa0f   :  { %v1318_v0 = vpop.xlane.xlu0 %1317 }
 0xa10   :  { %v1320_v1 = vmul.f32 0.03125, %v1318_v0  ;;  %v1315_v2 = vpop.xlane.xlu1 %1314 }
 0xa11   :  { %v1319_v3 = vmul.f32 0.03125, %v1315_v2 }
 0xa12   :  { %v1322_v4 = vsub.f32 %v1312_v62, %v1320_v1 }
 0xa13   :  { %v1321_v6 = vsub.f32 %v1311_v63, %v1319_v3 }
 0xa14   :  { %v1324_v8 = vmul.f32 %v1322_v4, %v1322_v4 }
 0xa15   :  { %v1323_v9 = vmul.f32 %v1321_v6, %v1321_v6 }
 0xa16   :  { %v1328_v10 = vsel %vm65_vm0, %v1324_v8, 0.0 }
 0xa17   :  { %1329 = vadd.xlane.f32.xlu0 %v1328_v10  ;;  %v1325_v11 = vsel %vm65_vm0, %v1323_v9, 0.0 }
 0xa18   :  { %1326 = vadd.xlane.f32.xlu1 %v1325_v11 }
 0xaa4   :  { %v1330_v12 = vpop.xlane.xlu0 %1329 }
 0xaa5   :  { %v1332_v7 = vmul.f32 0.03125, %v1330_v12  ;;  %v1327_v5 = vpop.xlane.xlu1 %1326 }
 0xaa6   :  { %v1331_v14 = vmul.f32 0.03125, %v1327_v5 }
 0xaa7   :  { %v1334_v15 = vadd.f32 1e-05, %v1332_v7 }
 0xaa8   :  { %v1333_v22 = vadd.f32 1e-05, %v1331_v14 }
 0xaa9   :  { %1735 = vrsqrt.f32 %v1334_v15 }
 0xaaa   :  { %1737 = vrsqrt.f32 %v1333_v22 }
 0xab3   :  { %v1736_v16 = vpop.eup %1735 }
 0xab4   :  { %v1738_v20 = vpop.eup %1737  ;;  %v1338_v21 = vmul.f32 %v1736_v16, %v1322_v4 }
 0xab5   :  { %v1337_v23 = vmul.f32 %v1738_v20, %v1321_v6 }
 0xab6   :  { %v1345_v25 = vmul.f32 %v1409_v18, %v1338_v21 }
 0xab7   :  { %v1344_v26 = vmul.f32 %v1409_v18, %v1337_v23 }
 0xab8   :  { %v1352_v27 = vadd.f32 %v1410_v24, %v1345_v25 }
 0xab9   :  { %v1351_v28 = vadd.f32 %v1410_v24, %v1344_v26 }
 0xaba   :  { %1354 = vst.msk [vmem:[#allocation8 + $0x8] sm:$0xff] %vm65_vm0, %v1352_v27 }
 0xabb   :  { %1353 = vst.msk [vmem:[#allocation8] sm:$0xff] %vm65_vm0, %v1351_v28 }
 0xabc   :  { %1816 = shalt.err (!%p1813_p0)
}
 0xabd   :  { %s1817_s7 = scalar_lea.hbm %s2042_s3, 256 }
 0xabe   :  { %p1818_p1 = scmp.ne.s32.totalorder %s2042_s3, %s1817_s7  ;;  %p1821_p2 = scmp.lt.u32.totalorder %s1817_s7, %s2042_s3 }
 0xac0   :  { %p1823_p3 = pnand %p1821_p2, %p1818_p1 }
 0xac2   :  { %1826 = shalt.err (!%p1823_p3)
}
 0xac3   :  { %1366 = dma.vmem_to_hbm [thread:$0]  %s1361_s30, 256, %s2042_s3, [#allocation4], %s1837_s1, %s1837_s1, %s1838_s9  }
 0xac4   :  { %1831 = dma.done.wait [#allocation4], 256  }
 0xac5   :  { %1832 = vsyncadd [#allocation4], 4294967040 }
 0xac6   :  { %1370 = vsyncpa [#allocation3], 1 }
 0xac7   :  { %1371 = vsyncpa [#allocation6], 1 }
 0xac8   :  { %1372 = vsyncpa [#allocation4], 1 }

</bundles_post_ra>
